<compile_context>
chip_gen: v7x
topology: tpu7x:2x2x1
jax: 0.10.0
libtpu: 0.0.40
codegen_flags: <defaults>
</compile_context>

<pallas_src>
import jax
import jax.numpy as jnp
from jax.experimental import pallas as pl
from jax.experimental.pallas import tpu as pltpu

_SUB = 8  # sublane count: batch tile must be a multiple of this


def _round_up(n, m):
    return ((n + m - 1) // m) * m


def _choose_tile_b(B, tile_b):
    """Pick a batch tile: multiple of 8, large enough to amortize per-step overhead,
    but small enough that the grid has >= 2 steps (v7x megacore gets both TCs busy)."""
    if tile_b is None:
        tile_b = 4096
    half = _round_up(max(1, -(-B // 2)), _SUB)   # round_up(ceil(B/2), 8)
    tile_b = min(tile_b, half)
    tile_b = max(_SUB, _round_up(tile_b, _SUB))
    return tile_b


def _gdisc_kernel(x_ref, w1_ref, b1_ref, w2_ref, b2_ref, o_ref):
    # GradReverse: identity in forward.
    # First linear + bias + ReLU (all f32; MXU accumulates in f32).
    h = jnp.dot(x_ref[...], w1_ref[...], preferred_element_type=jnp.float32)
    h = jnp.maximum(h + b1_ref[...], 0.0)        # b1 is (1, d1), broadcasts over batch tile
    # Dropout(0.5) skipped (identity in eval mode); second linear + bias.
    out = jnp.dot(h, w2_ref[...], preferred_element_type=jnp.float32)
    o_ref[...] = (out + b2_ref[...]).astype(o_ref.dtype)


def gdiscriminator_forward(x, w1, b1, w2, b2, *, tile_b=None):
    """Fused forward: relu(x @ w1 + b1) @ w2 + b2.

    x:  [B, d0]   w1: [d0, d1]   b1: [d1]   w2: [d1, d2]   b2: [d2]
    """
    B, d0 = x.shape
    d1 = w1.shape[1]
    d2 = w2.shape[1]

    x = x.astype(jnp.float32)
    w1 = w1.astype(jnp.float32)
    w2 = w2.astype(jnp.float32)
    b1 = b1.reshape(1, d1).astype(jnp.float32)
    b2 = b2.reshape(1, d2).astype(jnp.float32)

    tile_b = _choose_tile_b(B, tile_b)
    grid = (pl.cdiv(B, tile_b),)

    # True (unpadded) HBM traffic / flops for the scheduler hint.
    flops = 2 * B * (d0 * d1 + d1 * d2)
    bytes_accessed = 4 * (B * d0 + d0 * d1 + d1 + d1 * d2 + d2 + B * d2)

    out = pl.pallas_call(
        _gdisc_kernel,
        out_shape=jax.ShapeDtypeStruct((B, d2), jnp.float32),
        grid_spec=pltpu.PrefetchScalarGridSpec(
            num_scalar_prefetch=0,
            grid=grid,
            in_specs=[
                # x tile marches over the batch; last dim == full array dim (legal block).
                pl.BlockSpec((tile_b, d0), lambda i: (i, 0)),
                # Weights / biases: full-dim blocks, resident in VMEM across all grid steps.
                pl.BlockSpec((d0, d1), lambda i: (0, 0)),
                pl.BlockSpec((1, d1), lambda i: (0, 0)),
                pl.BlockSpec((d1, d2), lambda i: (0, 0)),
                pl.BlockSpec((1, d2), lambda i: (0, 0)),
            ],
            out_specs=pl.BlockSpec((tile_b, d2), lambda i: (i, 0)),
        ),
        compiler_params=pltpu.CompilerParams(
            dimension_semantics=("parallel",),   # megacore sharding of the batch axis
        ),
        cost_estimate=pl.CostEstimate(
            flops=flops, transcendentals=0, bytes_accessed=bytes_accessed),
    )(x, w1, b1, w2, b2)

    return out


def reference_forward(x, w1, b1, w2, b2):
    h = jnp.maximum(x @ w1 + b1.reshape(1, -1), 0.0)
    return h @ w2 + b2.reshape(1, -1)


if __name__ == "__main__":
    # Shapes consistent with GDiscriminator(dims=[32, 64, 8]); batch sized so the
    # grid has >= 2 steps (pipelining / both cores exercised) while staying small.
    B, d0, d1, d2 = 256, 32, 64, 8

    key = jax.random.PRNGKey(0)
    kx, k1, k2, k3, k4 = jax.random.split(key, 5)

    x = jax.random.normal(kx, (B, d0), dtype=jnp.float32)
    # Deterministic synthetic params, scaled like default nn.Linear init.
    w1 = jax.random.uniform(k1, (d0, d1), jnp.float32, -1.0, 1.0) / jnp.sqrt(d0)
    b1 = jax.random.uniform(k2, (d1,), jnp.float32, -1.0, 1.0) / jnp.sqrt(d0)
    w2 = jax.random.uniform(k3, (d1, d2), jnp.float32, -1.0, 1.0) / jnp.sqrt(d1)
    b2 = jax.random.uniform(k4, (d2,), jnp.float32, -1.0, 1.0) / jnp.sqrt(d1)

    out = gdiscriminator_forward(x, w1, b1, w2, b2)
    out = jax.block_until_ready(out)

    ref = reference_forward(x, w1, b1, w2, b2)
    assert out.shape == (B, d2)
    # f32 end-to-end; small tolerance covers MXU pass rounding differences.
    assert jnp.allclose(out, ref, atol=2e-2, rtol=2e-2)

    print("KERNEL_OK")
</pallas_src>

<mosaic_0001>
module attributes {stable_mosaic.version = 11 : i64} {
  func.func @_gdisc_kernel(%arg0: i32, %arg1: memref<128x32xf32, #tpu.memory_space<vmem>>, %arg2: memref<32x64xf32, #tpu.memory_space<vmem>>, %arg3: memref<1x64xf32, #tpu.memory_space<vmem>>, %arg4: memref<64x8xf32, #tpu.memory_space<vmem>>, %arg5: memref<1x8xf32, #tpu.memory_space<vmem>>, %arg6: memref<128x8xf32, #tpu.memory_space<vmem>>) attributes {dimension_semantics = [#tpu.dimension_semantics<parallel>], iteration_bounds = array<i64: 2>, scalar_prefetch = 0 : i64, scratch_operands = 0 : i64, tpu.core_type = #tpu.core_type<tc>, window_params = [{transform_indices = @transform_0, window_bounds = array<i64: 128, 32>}, {pipeline_mode = #tpu.pipeline_mode<synchronous>, transform_indices = @transform_1, window_bounds = array<i64: 32, 64>}, {pipeline_mode = #tpu.pipeline_mode<synchronous>, transform_indices = @transform_2, window_bounds = array<i64: 1, 64>}, {pipeline_mode = #tpu.pipeline_mode<synchronous>, transform_indices = @transform_3, window_bounds = array<i64: 64, 8>}, {pipeline_mode = #tpu.pipeline_mode<synchronous>, transform_indices = @transform_4, window_bounds = array<i64: 1, 8>}, {transform_indices = @transform_5, window_bounds = array<i64: 128, 8>}]} {
    %c0 = arith.constant 0 : index
    %c0_0 = arith.constant 0 : index
    %0 = vector.load %arg1[%c0, %c0_0] : memref<128x32xf32, #tpu.memory_space<vmem>>, vector<128x32xf32>
    %c0_1 = arith.constant 0 : index
    %c0_2 = arith.constant 0 : index
    %1 = vector.load %arg2[%c0_1, %c0_2] : memref<32x64xf32, #tpu.memory_space<vmem>>, vector<32x64xf32>
    %cst = arith.constant dense<0.000000e+00> : vector<128x64xf32>
    %2 = tpu.matmul %0, %1, %cst {dimension_numbers = #tpu.dot_dimension_numbers<[1], [0], [0], [1], [0, 0, 1, 1], [], []>} : vector<128x32xf32>, vector<32x64xf32>, vector<128x64xf32> -> vector<128x64xf32>
    %c0_3 = arith.constant 0 : index
    %c0_4 = arith.constant 0 : index
    %3 = vector.load %arg3[%c0_3, %c0_4] : memref<1x64xf32, #tpu.memory_space<vmem>>, vector<1x64xf32>
    %4 = vector.broadcast %3 : vector<1x64xf32> to vector<128x64xf32>
    %5 = arith.addf %2, %4 : vector<128x64xf32>
    %cst_5 = arith.constant 0.000000e+00 : f32
    %6 = vector.broadcast %cst_5 : f32 to vector<128x64xf32>
    %7 = arith.maximumf %5, %6 : vector<128x64xf32>
    %c0_6 = arith.constant 0 : index
    %c0_7 = arith.constant 0 : index
    %8 = vector.load %arg4[%c0_6, %c0_7] : memref<64x8xf32, #tpu.memory_space<vmem>>, vector<64x8xf32>
    %cst_8 = arith.constant dense<0.000000e+00> : vector<128x8xf32>
    %9 = tpu.matmul %7, %8, %cst_8 {dimension_numbers = #tpu.dot_dimension_numbers<[1], [0], [0], [1], [0, 0, 1, 1], [], []>} : vector<128x64xf32>, vector<64x8xf32>, vector<128x8xf32> -> vector<128x8xf32>
    %c0_9 = arith.constant 0 : index
    %c0_10 = arith.constant 0 : index
    %10 = vector.load %arg5[%c0_9, %c0_10] : memref<1x8xf32, #tpu.memory_space<vmem>>, vector<1x8xf32>
    %11 = vector.broadcast %10 : vector<1x8xf32> to vector<128x8xf32>
    %12 = arith.addf %9, %11 : vector<128x8xf32>
    %c0_11 = arith.constant 0 : index
    %c0_12 = arith.constant 0 : index
    %13 = vector.load %arg6[%c0_11, %c0_12] : memref<128x8xf32, #tpu.memory_space<vmem>>, vector<128x8xf32>
    tpu.vector_store %arg6[%c0_11, %c0_12], %12 {strides = array<i32>} : memref<128x8xf32, #tpu.memory_space<vmem>>, vector<128x8xf32>,
    return
  }
  func.func @transform_0(%arg0: i32) -> (i32, i32) {
    %c0_i32 = arith.constant 0 : i32
    %c0_i32_0 = arith.constant 0 : i32
    return %arg0, %c0_i32 : i32, i32
  }
  func.func @transform_1(%arg0: i32) -> (i32, i32) {
    %c0_i32 = arith.constant 0 : i32
    %c0_i32_0 = arith.constant 0 : i32
    %c0_i32_1 = arith.constant 0 : i32
    return %c0_i32, %c0_i32_0 : i32, i32
  }
  func.func @transform_2(%arg0: i32) -> (i32, i32) {
    %c0_i32 = arith.constant 0 : i32
    %c0_i32_0 = arith.constant 0 : i32
    %c0_i32_1 = arith.constant 0 : i32
    return %c0_i32, %c0_i32_0 : i32, i32
  }
  func.func @transform_3(%arg0: i32) -> (i32, i32) {
    %c0_i32 = arith.constant 0 : i32
    %c0_i32_0 = arith.constant 0 : i32
    %c0_i32_1 = arith.constant 0 : i32
    return %c0_i32, %c0_i32_0 : i32, i32
  }
  func.func @transform_4(%arg0: i32) -> (i32, i32) {
    %c0_i32 = arith.constant 0 : i32
    %c0_i32_0 = arith.constant 0 : i32
    %c0_i32_1 = arith.constant 0 : i32
    return %c0_i32, %c0_i32_0 : i32, i32
  }
  func.func @transform_5(%arg0: i32) -> (i32, i32) {
    %c0_i32 = arith.constant 0 : i32
    %c0_i32_0 = arith.constant 0 : i32
    return %arg0, %c0_i32 : i32, i32
  }
}

</mosaic_0001>

<bundles_post_ra>
// kernel: tpu_custom_call.1
= control target key start
LH: loop header
LB: loop body
LE: loop exit
PB: predicated region body
PF: predicated region fallthrough
CT: control target
= control target key end

     0   :  { %s986_s18 = smov 0   ;;  %s1136_s0 = inlined_call_operand.vmem [shape: f32[256,32], index: 0, kind: input, shape index: {}]   ;;  %s1137_s1 = inlined_call_operand.vmem [shape: f32[32,64], index: 1, kind: input, shape index: {}]   ;;  %s1138_s2 = inlined_call_operand.vmem [shape: f32[1,64], index: 2, kind: input, shape index: {}]   ;;  %s1139_s3 = inlined_call_operand.vmem [shape: f32[64,8], index: 3, kind: input, shape index: {}]   ;;  %s1140_s4 = inlined_call_operand.vmem [shape: f32[1,8], index: 4, kind: input, shape index: {}]   ;;  %s1141_s5 = inlined_call_operand.vmem [shape: f32[256,8], index: 5, kind: output, shape index: {}]  }
   0x1 LB: > { %s747_s19 = sadd.s32 4294967295, %s954_s18   ;;  %p751_p0 = scmp.ge.s32.totalorder %s954_s18, 1  ;;  %s954_s18 = sphi %s986_s18, %s15_s18  }
   0x2   : > { %p188_p1 = scmp.lt.s32.totalorder %s954_s18, 3 }
   0x4   : > { %p189_p2 = pnand %p751_p0, %p188_p1 }
   0x5   : > { %v244_v0 = vld [vmem:[%s1137_s1] sm:$0xff] (!%p189_p2)  ;;  %v245_v1 = vld [vmem:[%s1137_s1 + $0x8] sm:$0xff] (!%p189_p2)  ;;  %v246_v2 = vld [vmem:[%s1137_s1 + $0x10] sm:$0xff] (!%p189_p2)  ;;  %s752_s26 = sshll.u32 (!%p189_p2), %s747_s19, 4  ;;  %vm255_vm0 = vcmask (!%p189_p2), 261120   ;;  %vm480_vm1 = vcmask (!%p189_p2), 523264  }
   0x6   : > { %192 = sbr.rel (%p189_p2) target bundleno = 480 (0x1e0), region = 40  ;;  %v908_v3 = vpack.c.bf16 (!%p189_p2), %v245_v1, %v244_v0  ;;  %v247_v4 = vld [vmem:[%s1137_s1 + $0x18] sm:$0xff] (!%p189_p2)  ;;  %p217_p3 = scmp.lt.s32.totalorder (!%p189_p2), %s752_s26, 31  ;;  %v465_v5 = vld [vmem:[%s1139_s3] sm:$0xff] (!%p189_p2)  ;;  %v466_v6 = vld [vmem:[%s1139_s3 + $0x8] sm:$0xff] (!%p189_p2)  ;;  %vm674_vm2 = vcmask (!%p189_p2), 64512  }
   0x7   : > { %v912_v7 = vpack.c.bf16 (!%p189_p2), %v247_v4, %v246_v2  ;;  %v916_v8 = vpack.c.bf16 (!%p189_p2), %v466_v6, %v465_v5  ;;  %v467_v9 = vld [vmem:[%s1139_s3 + $0x10] sm:$0xff] (!%p189_p2)  ;;  %v468_v10 = vld [vmem:[%s1139_s3 + $0x18] sm:$0xff] (!%p189_p2)  ;;  %v469_v12 = vld [vmem:[%s1139_s3 + $0x20] sm:$0xff] (!%p189_p2) }
   0x8   : > { %909 = vmatprep.subr.bf16.mxu0 (!%p189_p2), %v908_v3  ;;  %v920_v11 = vpack.c.bf16 (!%p189_p2), %v468_v10, %v467_v9  ;;  %v470_v13 = vld [vmem:[%s1139_s3 + $0x28] sm:$0xff] (!%p189_p2)  ;;  %v471_v31 = vld [vmem:[%s1139_s3 + $0x30] sm:$0xff] (!%p189_p2)  ;;  %v472_v32 = vld [vmem:[%s1139_s3 + $0x38] sm:$0xff] (!%p189_p2) }
   0x9   : > { %911 = vmatpush3.bf16.msra.mxu0 (!%p189_p2), %v908_v3  ;;  %932 = vmatprep.subr.bf16.mxu1 (!%p189_p2), %v916_v8  ;;  %v924_v16 = vpack.c.bf16 (!%p189_p2), %v470_v13, %v469_v12  ;;  %v928_v33 = vpack.c.bf16 (!%p189_p2), %v472_v32, %v471_v31  ;;  %v756_v34 = vld [vmem:[%s1138_s2] ss:$0 sm:$0xff] (!%p189_p2) }
   0xa   : > { %913 = vmatprep.subr.bf16.mxu0 (!%p189_p2), %v912_v7  ;;  %936 = vmatpush3.bf16.msra.mxu1 (!%p189_p2), %v916_v8 }
   0xb   : > { %933 = vmatprep.subr.bf16.mxu1 (!%p189_p2), %v920_v11 }
   0xd   : > { %s1143_s26 = smov (!%p217_p3, %s752_s26), 31  ;;  %915 = vmatpush3.bf16.msra.mxu0 %v912_v7 }
   0xe   : > { %s753_s12 = sshll.u32 %s1143_s26, 3  ;;  %917 = vmatprep.subr.bf16.mxu0 %v916_v8  ;;  %937 = vmatpush3.bf16.msra.mxu1 %v920_v11 }
   0xf   : > { %s1032_s20 = scalar_lea.vmem %s1136_s0, %s753_s12  ;;  %934 = vmatprep.subr.bf16.mxu1 %v924_v16  ;;  %s1099_s7 = scalar_lea.vmem %s1141_s5, %s753_s12 }
  0x10   : > { %v228_v14 = vld [vmem:[%s1032_s20] sm:$0xff]  ;;  %v229_v15 = vld [vmem:[%s1032_s20 + $0x8] sm:$0xff]  ;;  %v230_v17 = vld [vmem:[%s1032_s20 + $0x10] sm:$0xff] }
  0x11   : > { %844 = vmatprep.mubr.msk.f32.mxu0 %vm255_vm0, %v228_v14  ;;  %v231_v18 = vld [vmem:[%s1032_s20 + $0x18] sm:$0xff]  ;;  %v232_v19 = vld [vmem:[%s1032_s20 + $0x20] sm:$0xff]  ;;  %v233_v20 = vld [vmem:[%s1032_s20 + $0x28] sm:$0xff] }
  0x12   : > { %845 = vmatmul.mubr.msk.f32.vlgmr.msra.gmra.mrb[0].mxu0 %vm255_vm0, %v229_v15  ;;  %938 = vmatpush3.bf16.msra.mxu1 %v924_v16  ;;  %v234_v21 = vld [vmem:[%s1032_s20 + $0x30] sm:$0xff]  ;;  %v235_v22 = vld [vmem:[%s1032_s20 + $0x38] sm:$0xff]  ;;  %v236_v23 = vld [vmem:[%s1032_s20 + $0x40] sm:$0xff] }
  0x13   : > { %847 = vmatprep.mubr.msk.f32.mxu0 %vm255_vm0, %v230_v17  ;;  %919 = vmatpush3.bf16.msra.mxu0 %v916_v8  ;;  %v237_v24 = vld [vmem:[%s1032_s20 + $0x48] sm:$0xff]  ;;  %v238_v25 = vld [vmem:[%s1032_s20 + $0x50] sm:$0xff]  ;;  %v239_v26 = vld [vmem:[%s1032_s20 + $0x58] sm:$0xff] }
  0x14   : > { %921 = vmatprep.subr.bf16.mxu0 %v920_v11  ;;  %v240_v27 = vld [vmem:[%s1032_s20 + $0x60] sm:$0xff]  ;;  %v241_v28 = vld [vmem:[%s1032_s20 + $0x68] sm:$0xff]  ;;  %v242_v29 = vld [vmem:[%s1032_s20 + $0x70] sm:$0xff]  ;;  %935 = vmatprep.subr.bf16.mxu1 %v928_v33 }
  0x15   : > { %v243_v30 = vld [vmem:[%s1032_s20 + $0x78] sm:$0xff] }
  0x16   : > { %848 = vmatmul.mubr.msk.f32.gmra.mrb[2].mxu0 %vm255_vm0, %v231_v18  ;;  %939 = vmatpush3.bf16.msra.mxu1 %v928_v33 }
  0x17   : > { %850 = vmatprep.mubr.msk.f32.mxu0 %vm255_vm0, %v232_v19  ;;  %923 = vmatpush3.bf16.msra.mxu0 %v920_v11  ;;  %v773_v19 = vld [vmem:[%s1140_s4] ss:$0 sm:$0xff] }
  0x18   : > { %925 = vmatprep.subr.bf16.mxu0 %v924_v16 }
  0x1a   : > { %851 = vmatmul.mubr.msk.f32.gmra.mrb[4].mxu0 %vm255_vm0, %v233_v20 }
  0x1b   : > { %853 = vmatprep.mubr.msk.f32.mxu0 %vm255_vm0, %v234_v21  ;;  %927 = vmatpush3.bf16.msra.mxu0 %v924_v16 }
  0x1c   : > { %929 = vmatprep.subr.bf16.mxu0 %v928_v33 }
  0x1e   : > { %854 = vmatmul.mubr.msk.f32.gmra.mrb[6].mxu0 %vm255_vm0, %v235_v22 }
  0x1f   : > { %856 = vmatprep.mubr.msk.f32.mxu0 %vm255_vm0, %v236_v23  ;;  %931 = vmatpush3.bf16.msra.mxu0 %v928_v33 }
  0x22   : > { %857 = vmatmul.mubr.msk.f32.gmra.mrb[8].mxu0 %vm255_vm0, %v237_v24 }
  0x23   : > { %859 = vmatprep.mubr.msk.f32.mxu0 %vm255_vm0, %v238_v25 }
  0x26   : > { %860 = vmatmul.mubr.msk.f32.gmra.mrb[10].mxu0 %vm255_vm0, %v239_v26 }
  0x27   : > { %862 = vmatprep.mubr.msk.f32.mxu0 %vm255_vm0, %v240_v27 }
  0x2a   : > { %863 = vmatmul.mubr.msk.f32.gmra.mrb[12].mxu0 %vm255_vm0, %v241_v28 }
  0x2b   : > { %865 = vmatprep.mubr.msk.f32.mxu0 %vm255_vm0, %v242_v29 }
  0x2e   : > { %866 = vmatmul.mubr.msk.f32.gmra.mrb[14].mxu0 %vm255_vm0, %v243_v30 }
  0xe5   : > { %v846_v35 = vpop.f32.mrb[0].mxu0 }
  0xe6   : > { %v376_v36 = vadd.f32 %v846_v35, %v756_v34  ;;  %v370_v37 = vpop.f32.mrb[1].mxu0 }
  0xe7   : > { %v371_v38 = vadd.f32 %v756_v34, %v370_v37 }
  0xe8   : > { %v450_v41 = vmax.f32 %v376_v36, 0.0 }
  0xe9   : > { %v449_v39 = vmax.f32 %v371_v38, 0.0  ;;  %v849_v40 = vpop.f32.mrb[2].mxu0 }
  0xea   : > { %v386_v42 = vadd.f32 %v849_v40, %v756_v34  ;;  %v380_v43 = vpop.f32.mrb[3].mxu0 }
  0xeb   : > { %v381_v44 = vadd.f32 %v756_v34, %v380_v43  ;;  %884 = vmatprep.mubr.msk.f32.mxu0 %vm480_vm1, %v449_v39 }
  0xec   : > { %885 = vmatmul.mubr.msk.f32.vlgmr.msra.gmra.mrb[16].mxu0 %vm480_vm1, %v450_v41  ;;  %v452_v47 = vmax.f32 %v386_v42, 0.0 }
  0xed   : > { %v451_v45 = vmax.f32 %v381_v44, 0.0  ;;  %v852_v46 = vpop.f32.mrb[4].mxu0 }
  0xee   : > { %v396_v48 = vadd.f32 %v852_v46, %v756_v34  ;;  %v390_v49 = vpop.f32.mrb[5].mxu0 }
  0xef   : > { %v391_v50 = vadd.f32 %v756_v34, %v390_v49  ;;  %887 = vmatprep.mubr.msk.f32.mxu1 %vm480_vm1, %v451_v45 }
  0xf0   : > { %888 = vmatmul.mubr.msk.f32.vlgmr.msra.gmra.mrb[0].mxu1 %vm480_vm1, %v452_v47  ;;  %v454_v53 = vmax.f32 %v396_v48, 0.0 }
  0xf1   : > { %v453_v51 = vmax.f32 %v391_v50, 0.0  ;;  %v855_v52 = vpop.f32.mrb[6].mxu0 }
  0xf2   : > { %v406_v54 = vadd.f32 %v855_v52, %v756_v34  ;;  %v400_v55 = vpop.f32.mrb[7].mxu0 }
  0xf3   : > { %v401_v56 = vadd.f32 %v756_v34, %v400_v55  ;;  %890 = vmatprep.mubr.msk.f32.mxu1 %vm480_vm1, %v453_v51 }
  0xf4   : > { %891 = vmatmul.mubr.msk.f32.gmra.mrb[2].mxu1 %vm480_vm1, %v454_v53  ;;  %v456_v59 = vmax.f32 %v406_v54, 0.0 }
  0xf5   : > { %v455_v57 = vmax.f32 %v401_v56, 0.0  ;;  %v858_v58 = vpop.f32.mrb[8].mxu0 }
  0xf6   : > { %v416_v60 = vadd.f32 %v858_v58, %v756_v34  ;;  %v410_v61 = vpop.f32.mrb[9].mxu0 }
  0xf7   : > { %v411_v62 = vadd.f32 %v756_v34, %v410_v61  ;;  %893 = vmatprep.mubr.msk.f32.mxu1 %vm480_vm1, %v455_v57 }
  0xf8   : > { %894 = vmatmul.mubr.msk.f32.gmra.mrb[4].mxu1 %vm480_vm1, %v456_v59  ;;  %v458_v1 = vmax.f32 %v416_v60, 0.0 }
  0xf9   : > { %v457_v63 = vmax.f32 %v411_v62, 0.0  ;;  %v861_v0 = vpop.f32.mrb[10].mxu0 }
  0xfa   : > { %v426_v2 = vadd.f32 %v861_v0, %v756_v34  ;;  %v420_v3 = vpop.f32.mrb[11].mxu0 }
  0xfb   : > { %v421_v4 = vadd.f32 %v756_v34, %v420_v3  ;;  %896 = vmatprep.mubr.msk.f32.mxu1 %vm480_vm1, %v457_v63 }
  0xfc   : > { %897 = vmatmul.mubr.msk.f32.gmra.mrb[6].mxu1 %vm480_vm1, %v458_v1  ;;  %v460_v7 = vmax.f32 %v426_v2, 0.0 }
  0xfd   : > { %v459_v5 = vmax.f32 %v421_v4, 0.0  ;;  %v864_v6 = vpop.f32.mrb[12].mxu0 }
  0xfe   : > { %v436_v8 = vadd.f32 %v864_v6, %v756_v34  ;;  %v430_v9 = vpop.f32.mrb[13].mxu0 }
  0xff   : > { %v431_v10 = vadd.f32 %v756_v34, %v430_v9  ;;  %899 = vmatprep.mubr.msk.f32.mxu1 %vm480_vm1, %v459_v5 }
 0x100   : > { %900 = vmatmul.mubr.msk.f32.gmra.mrb[8].mxu1 %vm480_vm1, %v460_v7  ;;  %v462_v13 = vmax.f32 %v436_v8, 0.0 }
 0x101   : > { %v461_v11 = vmax.f32 %v431_v10, 0.0  ;;  %v867_v12 = vpop.f32.mrb[14].mxu0 }
 0x102   : > { %v446_v14 = vadd.f32 %v867_v12, %v756_v34  ;;  %v440_v15 = vpop.f32.mrb[15].mxu0 }
 0x103   : > { %v441_v16 = vadd.f32 %v756_v34, %v440_v15  ;;  %902 = vmatprep.mubr.msk.f32.mxu1 %vm480_vm1, %v461_v11 }
 0x104   : > { %903 = vmatmul.mubr.msk.f32.gmra.mrb[10].mxu1 %vm480_vm1, %v462_v13  ;;  %v464_v18 = vmax.f32 %v446_v14, 0.0 }
 0x105   : > { %v463_v17 = vmax.f32 %v441_v16, 0.0 }
 0x107   : > { %905 = vmatprep.mubr.msk.f32.mxu1 %vm480_vm1, %v463_v17 }
 0x108   : > { %906 = vmatmul.mubr.msk.f32.gmra.mrb[12].mxu1 %vm480_vm1, %v464_v18 }
 0x1bf   : > { %v886_v20 = vpop.f32.mrb[16].mxu0 }
 0x1c0   : > { %v601_v21 = vadd.f32 %v886_v20, %v773_v19  ;;  %v595_v22 = vpop.f32.mrb[17].mxu0 }
 0x1c1   : > { %v596_v23 = vadd.f32 %v773_v19, %v595_v22 }
 0x1c2   : > { %676 = vst.msk [vmem:[%s1099_s7 + $0x8] sm:$0xff] %vm674_vm2, %v601_v21 }
 0x1c3   : > { %675 = vst.msk [vmem:[%s1099_s7] sm:$0xff] %vm674_vm2, %v596_v23  ;;  %v889_v24 = vpop.f32.mrb[0].mxu1 }
 0x1c4   : > { %v611_v25 = vadd.f32 %v889_v24, %v773_v19  ;;  %v605_v26 = vpop.f32.mrb[1].mxu1 }
 0x1c5   : > { %v606_v27 = vadd.f32 %v773_v19, %v605_v26 }
 0x1c6   : > { %678 = vst.msk [vmem:[%s1099_s7 + $0x18] sm:$0xff] %vm674_vm2, %v611_v25 }
 0x1c7   : > { %677 = vst.msk [vmem:[%s1099_s7 + $0x10] sm:$0xff] %vm674_vm2, %v606_v27  ;;  %v892_v28 = vpop.f32.mrb[2].mxu1 }
 0x1c8   : > { %v621_v29 = vadd.f32 %v892_v28, %v773_v19  ;;  %v615_v30 = vpop.f32.mrb[3].mxu1 }
 0x1c9   : > { %v616_v31 = vadd.f32 %v773_v19, %v615_v30 }
 0x1ca   : > { %680 = vst.msk [vmem:[%s1099_s7 + $0x28] sm:$0xff] %vm674_vm2, %v621_v29 }
 0x1cb   : > { %679 = vst.msk [vmem:[%s1099_s7 + $0x20] sm:$0xff] %vm674_vm2, %v616_v31  ;;  %v895_v32 = vpop.f32.mrb[4].mxu1 }
 0x1cc   : > { %v631_v33 = vadd.f32 %v895_v32, %v773_v19  ;;  %v625_v34 = vpop.f32.mrb[5].mxu1 }
 0x1cd   : > { %v626_v35 = vadd.f32 %v773_v19, %v625_v34 }
 0x1ce   : > { %682 = vst.msk [vmem:[%s1099_s7 + $0x38] sm:$0xff] %vm674_vm2, %v631_v33 }
 0x1cf   : > { %681 = vst.msk [vmem:[%s1099_s7 + $0x30] sm:$0xff] %vm674_vm2, %v626_v35  ;;  %v898_v36 = vpop.f32.mrb[6].mxu1 }
 0x1d0   : > { %v641_v37 = vadd.f32 %v898_v36, %v773_v19  ;;  %v635_v38 = vpop.f32.mrb[7].mxu1 }
 0x1d1   : > { %v636_v39 = vadd.f32 %v773_v19, %v635_v38 }
 0x1d2   : > { %684 = vst.msk [vmem:[%s1099_s7 + $0x48] sm:$0xff] %vm674_vm2, %v641_v37 }
 0x1d3   : > { %683 = vst.msk [vmem:[%s1099_s7 + $0x40] sm:$0xff] %vm674_vm2, %v636_v39  ;;  %v901_v40 = vpop.f32.mrb[8].mxu1 }
 0x1d4   : > { %v651_v41 = vadd.f32 %v901_v40, %v773_v19  ;;  %v645_v42 = vpop.f32.mrb[9].mxu1 }
 0x1d5   : > { %v646_v43 = vadd.f32 %v773_v19, %v645_v42 }
 0x1d6   : > { %686 = vst.msk [vmem:[%s1099_s7 + $0x58] sm:$0xff] %vm674_vm2, %v651_v41 }
 0x1d7   : > { %685 = vst.msk [vmem:[%s1099_s7 + $0x50] sm:$0xff] %vm674_vm2, %v646_v43  ;;  %v904_v44 = vpop.f32.mrb[10].mxu1 }
 0x1d8   : > { %v661_v45 = vadd.f32 %v904_v44, %v773_v19  ;;  %v655_v46 = vpop.f32.mrb[11].mxu1 }
 0x1d9   : > { %v656_v47 = vadd.f32 %v773_v19, %v655_v46 }
 0x1da   : > { %688 = vst.msk [vmem:[%s1099_s7 + $0x68] sm:$0xff] %vm674_vm2, %v661_v45 }
 0x1db   : > { %687 = vst.msk [vmem:[%s1099_s7 + $0x60] sm:$0xff] %vm674_vm2, %v656_v47  ;;  %v907_v48 = vpop.f32.mrb[12].mxu1 }
 0x1dc   : > { %v671_v49 = vadd.f32 %v907_v48, %v773_v19  ;;  %v665_v50 = vpop.f32.mrb[13].mxu1 }
 0x1dd   : > { %v666_v51 = vadd.f32 %v773_v19, %v665_v50 }
 0x1de   : > { %690 = vst.msk [vmem:[%s1099_s7 + $0x78] sm:$0xff] %vm674_vm2, %v671_v49 }
 0x1df   : > { %689 = vst.msk [vmem:[%s1099_s7 + $0x70] sm:$0xff] %vm674_vm2, %v666_v51 }
 0x1e0 PF: > { %s15_s18 = sadd.s32 1, %s954_s18  }
 0x1e1   : > { %p12_p4 = scmp.ge.s32.totalorder %s15_s18, 4  }
 0x1e3   :  { %14 = sbr.rel (!%p12_p4) target bundleno = 1 (0x1), region = 70 }

</bundles_post_ra>
